<compile_context>
chip_gen: v6e
topology: v6e:2x2x1
jax: 0.10.0
libtpu: 0.0.40
codegen_flags: <defaults>
</compile_context>

<pallas_src>
import math

import jax
import jax.numpy as jnp
import numpy as np
from jax.experimental import pallas as pl
from jax.experimental.pallas import tpu as pltpu


# ----------------------------------------------------------------------------- helpers
def _round_up(x, m):
    return ((x + m - 1) // m) * m


def _cdiv(a, b):
    return (a + b - 1) // b


def _vmem_capacity_bytes():
    """Physical VMEM of the current generation; conservative v7x default."""
    try:
        info = pltpu.get_tpu_info()
        cap = getattr(info, "vmem_capacity_bytes", None)
        if cap:
            return int(cap)
    except Exception:
        pass
    return 64 * 1024 * 1024  # v7x per-TC VMEM (smallest of the targets)


def _erf_poly(x):
    # Abramowitz & Stegun 7.1.26 polynomial erf, |err| < 1.5e-7 (matches PyTorch's
    # exact erf-based GELU to f32/bf16 tolerance).  The 1/(1+p|x|) term goes to the
    # EUP via approx reciprocal (separate VLIW slot -> ~free under the MXU).
    a1, a2, a3, a4, a5 = 0.254829592, -0.284496736, 1.421413741, -1.453152027, 1.061405429
    p = 0.3275911
    ax = jnp.abs(x)
    t = pl.reciprocal(1.0 + p * ax, approx=True)
    poly = ((((a5 * t + a4) * t + a3) * t + a2) * t + a1) * t
    y = 1.0 - poly * jnp.exp(-ax * ax)
    return jnp.where(x >= 0, y, -y)


def _gelu_exact(x):
    return 0.5 * x * (1.0 + _erf_poly(x * (1.0 / math.sqrt(2.0))))


# ----------------------------------------------------------------------------- kernels
def _ffn_kernel_acc_in_out(x_ref, w1_ref, w2_ref, o_ref):
    """f32-output variant: accumulate directly into the VMEM-resident output block.

    x_ref : (block_m, D)   token tile (compute dtype)
    w1_ref: (D, block_h)   W1^T hidden-chunk
    w2_ref: (block_h, D)   W2^T hidden-chunk
    o_ref : (block_m, D)   f32 output tile, block index constant in j -> resident
    """
    j = pl.program_id(1)

    @pl.when(j == 0)
    def _():
        o_ref[...] = jnp.zeros_like(o_ref)

    h = jnp.dot(x_ref[...], w1_ref[...], preferred_element_type=jnp.float32)
    h = _gelu_exact(h)                      # elementwise in H -> exact per chunk
    o_ref[...] += jnp.dot(h.astype(w2_ref.dtype), w2_ref[...],
                          preferred_element_type=jnp.float32)


def _ffn_kernel_scratch(x_ref, w1_ref, w2_ref, o_ref, acc_ref):
    """Generic variant (non-f32 outputs): f32 VMEM scratch accumulator."""
    j = pl.program_id(1)

    @pl.when(j == 0)
    def _():
        acc_ref[...] = jnp.zeros_like(acc_ref)

    h = jnp.dot(x_ref[...], w1_ref[...], preferred_element_type=jnp.float32)
    h = _gelu_exact(h)
    acc_ref[...] += jnp.dot(h.astype(w2_ref.dtype), w2_ref[...],
                            preferred_element_type=jnp.float32)

    @pl.when(j == pl.num_programs(1) - 1)
    def _():
        o_ref[...] = acc_ref[...].astype(o_ref.dtype)


# ----------------------------------------------------------------------------- tile selection
def _pick_block_h(H, target, align):
    """Largest `align`-aligned divisor of H that is <= target (or full H)."""
    target = int(target)
    if H <= max(target, align):
        return H
    bh = (min(target, H) // align) * align
    while bh >= align:
        if H % bh == 0:
            return bh
        bh -= align
    # No aligned divisor under the target; smallest aligned divisor, else full H.
    bh = align
    while bh <= H:
        if H % bh == 0:
            return bh
        bh += align
    return H  # TODO(synk): pad H instead of falling back for ragged hidden sizes.


def _select_tiles(N, D, H, in_bytes, out_bytes, budget, *, use_scratch,
                  block_m=None, block_h=None):
    # ---- token tile ---------------------------------------------------------
    if block_m is None:
        if N >= 2048:
            tgt = 1024          # v6e needs block_m >~ 714 (bf16) to be MXU-bound
        elif N >= 512:
            tgt = 512
        else:
            tgt = 256
        block_m = min(tgt, _round_up(N, 8))
        # Keep >= 2 token tiles so the "parallel" axis feeds both v7x TensorCores
        # (harmless on single-TC v5e/v6e).
        if N >= 512:
            block_m = min(block_m, _round_up(_cdiv(N, 2), 8))
    block_m = max(8, _round_up(min(block_m, _round_up(N, 8)), 8))

    def m_bytes(bm):
        b = 2 * bm * D * in_bytes + 2 * bm * D * out_bytes   # x + out, double-buffered
        if use_scratch:
            b += bm * D * 4                                  # f32 accumulator
        return b

    # ---- hidden chunk: budget-driven (W1 and W2 chunks, each double-buffered) --
    align_h = 256 if H % 256 == 0 else 128
    if block_h is None:
        per_h = 4 * D * in_bytes                 # bytes of weight buffers per hidden unit
        avail = max(budget - m_bytes(block_m), per_h * align_h)
        block_h = _pick_block_h(H, avail // per_h, align_h)
    elif block_h != H and H % block_h != 0:
        block_h = _pick_block_h(H, block_h, align_h)

    # ---- shrink the token tile if the total footprint overshoots the budget ----
    def footprint(bm, bh):
        return m_bytes(bm) + 4 * D * bh * in_bytes
    while footprint(block_m, block_h) > budget and block_m > 256:
        block_m = max(256, _round_up(block_m // 2, 8))

    return block_m, block_h, footprint(block_m, block_h)


# ----------------------------------------------------------------------------- wrapper
def prepare_ffn_weights(w1, w2, dtype=jnp.bfloat16):
    """One-time (init-time) layout + dtype conversion of the PyTorch Linear weights.

    w1: (H, D) = Linear(dim, hidden).weight  ->  returns W1^T (D, H)
    w2: (D, H) = Linear(hidden, dim).weight  ->  returns W2^T (H, D)
    """
    return jnp.transpose(w1).astype(dtype), jnp.transpose(w2).astype(dtype)


def feed_forward_pallas(x, w1, w2, *, weights_transposed=False,
                        block_m=None, block_h=None,
                        compute_dtype=jnp.bfloat16):
    """FeedForward forward pass (eval mode).

    x : (..., D)
    If weights_transposed: w1 is (D, H) == W1^T, w2 is (H, D) == W2^T (init-time layout).
    Otherwise:            w1 is (H, D), w2 is (D, H) (PyTorch layout; transposed here).
    Returns y with the same shape/dtype as x.
    """
    orig_shape = x.shape
    D = orig_shape[-1]

    if weights_transposed:
        H = w1.shape[1]
        assert w1.shape == (D, H) and w2.shape == (H, D)
        w1_t, w2_t = w1, w2
    else:
        # TODO(synk): in a real model store the weights pre-transposed at init so
        # this per-call HBM transpose never materializes.
        H = w1.shape[0]
        assert w1.shape == (H, D) and w2.shape == (D, H)
        w1_t, w2_t = jnp.transpose(w1), jnp.transpose(w2)

    w1_t = w1_t.astype(compute_dtype)
    w2_t = w2_t.astype(compute_dtype)

    x2 = x.reshape(-1, D).astype(compute_dtype)
    N = x2.shape[0]
    out_dtype = x.dtype

    in_bytes = jnp.dtype(compute_dtype).itemsize
    out_bytes = jnp.dtype(out_dtype).itemsize
    use_scratch = jnp.dtype(out_dtype) != jnp.dtype(jnp.float32)

    cap = _vmem_capacity_bytes()
    budget = int(cap * 0.8)           # headroom under 64 MiB (v7x) / 128 MiB (v5e/v6e)

    block_m, block_h, footprint = _select_tiles(
        N, D, H, in_bytes, out_bytes, budget,
        use_scratch=use_scratch, block_m=block_m, block_h=block_h)

    grid = (pl.cdiv(N, block_m), H // block_h)
    vmem_limit = int(min(cap, max(footprint * 5 // 4 + (4 << 20), 32 << 20)))

    kernel = _ffn_kernel_scratch if use_scratch else _ffn_kernel_acc_in_out
    scratch = ([pltpu.VMEM((block_m, D), jnp.float32)] if use_scratch else [])

    out = pl.pallas_call(
        kernel,
        out_shape=jax.ShapeDtypeStruct((N, D), out_dtype),
        grid_spec=pltpu.PrefetchScalarGridSpec(
            num_scalar_prefetch=0,
            grid=grid,
            in_specs=[
                pl.BlockSpec((block_m, D), lambda i, j: (i, 0)),   # x tile
                pl.BlockSpec((D, block_h), lambda i, j: (0, j)),   # W1^T hidden-chunk
                pl.BlockSpec((block_h, D), lambda i, j: (j, 0)),   # W2^T hidden-chunk
            ],
            out_specs=pl.BlockSpec((block_m, D), lambda i, j: (i, 0)),
            scratch_shapes=scratch,
        ),
        compiler_params=pltpu.CompilerParams(
            dimension_semantics=("parallel", "arbitrary"),
            vmem_limit_bytes=vmem_limit,
        ),
    )(x2, w1_t, w2_t)

    return out.reshape(orig_shape)


# ----------------------------------------------------------------------------- pure-JAX reference
def feed_forward_reference(x, w1, w2):
    """f32 reference: GELU_exact(x @ W1^T) @ W2^T with PyTorch-layout weights."""
    D = x.shape[-1]
    xf = x.reshape(-1, D).astype(jnp.float32)
    h = jax.nn.gelu(xf @ w1.astype(jnp.float32).T, approximate=False)
    y = h @ w2.astype(jnp.float32).T
    return y.reshape(x.shape)


# ----------------------------------------------------------------------------- main
if __name__ == "__main__":
    key = jax.random.PRNGKey(0)
    k_x, k_w1, k_w2, k_x2, k_w1b, k_w2b = jax.random.split(key, 6)

    # ---- test 1: dim=32, hidden=64 (single hidden chunk, 2 token tiles) -------
    B, T, D, H = 2, 8, 32, 64
    x = jax.random.normal(k_x, (B, T, D), jnp.float32)
    # PyTorch-Linear-like init: U(-1/sqrt(fan_in), 1/sqrt(fan_in)), bias=False.
    w1 = jax.random.uniform(k_w1, (H, D), jnp.float32,
                            -1.0 / math.sqrt(D), 1.0 / math.sqrt(D))
    w2 = jax.random.uniform(k_w2, (D, H), jnp.float32,
                            -1.0 / math.sqrt(H), 1.0 / math.sqrt(H))
    w1_t, w2_t = prepare_ffn_weights(w1, w2)          # init-time layout, no per-call transpose

    out = feed_forward_pallas(x, w1_t, w2_t, weights_transposed=True, block_m=8)
    out = jax.block_until_ready(out)
    ref = feed_forward_reference(x, w1, w2)
    np.testing.assert_allclose(np.asarray(out, np.float32), np.asarray(ref),
                               rtol=2e-2, atol=2e-2)   # bf16-compute tolerance

    # ---- test 2: dim=128, hidden=256, grid=(2,2) exercises the hidden reduction --
    D2, H2 = 128, 256
    x2 = jax.random.normal(k_x2, (B, T, D2), jnp.float32)
    w1b = jax.random.uniform(k_w1b, (H2, D2), jnp.float32,
                             -1.0 / math.sqrt(D2), 1.0 / math.sqrt(D2))
    w2b = jax.random.uniform(k_w2b, (D2, H2), jnp.float32,
                             -1.0 / math.sqrt(H2), 1.0 / math.sqrt(H2))
    w1b_t, w2b_t = prepare_ffn_weights(w1b, w2b)

    out2 = feed_forward_pallas(x2, w1b_t, w2b_t, weights_transposed=True,
                               block_m=8, block_h=128)
    out2 = jax.block_until_ready(out2)
    ref2 = feed_forward_reference(x2, w1b, w2b)
    np.testing.assert_allclose(np.asarray(out2, np.float32), np.asarray(ref2),
                               rtol=2e-2, atol=2e-2)

    # ---- test 3: bf16 activations/output -> exercises the f32-scratch variant ----
    out3 = feed_forward_pallas(x2.astype(jnp.bfloat16), w1b_t, w2b_t,
                               weights_transposed=True, block_m=8, block_h=128)
    out3 = jax.block_until_ready(out3)
    np.testing.assert_allclose(np.asarray(out3, np.float32), np.asarray(ref2),
                               rtol=4e-2, atol=4e-2)

    print("KERNEL_OK")
</pallas_src>

<mosaic_0001>
module attributes {stable_mosaic.version = 11 : i64} {
  func.func @_ffn_kernel_acc_in_out(%arg0: i32, %arg1: i32, %arg2: memref<8x32xbf16, #tpu.memory_space<vmem>>, %arg3: memref<32x64xbf16, #tpu.memory_space<vmem>>, %arg4: memref<64x32xbf16, #tpu.memory_space<vmem>>, %arg5: memref<8x32xf32, #tpu.memory_space<vmem>>) attributes {dimension_semantics = [#tpu.dimension_semantics<parallel>, #tpu.dimension_semantics<arbitrary>], iteration_bounds = array<i64: 2, 1>, scalar_prefetch = 0 : i64, scratch_operands = 0 : i64, tpu.core_type = #tpu.core_type<tc>, window_params = [{transform_indices = @transform_0, window_bounds = array<i64: 8, 32>}, {transform_indices = @transform_1, window_bounds = array<i64: 32, 64>}, {transform_indices = @transform_2, window_bounds = array<i64: 64, 32>}, {transform_indices = @transform_3, window_bounds = array<i64: 8, 32>}]} {
    %c0_i32 = arith.constant 0 : i32
    %0 = arith.cmpi eq, %arg1, %c0_i32 : i32
    %1 = arith.extui %0 : i1 to i32
    %c0_i32_0 = arith.constant 0 : i32
    %2 = arith.cmpi ne, %1, %c0_i32_0 : i32
    scf.if %2 {
      %cst_25 = arith.constant 0.000000e+00 : f32
      %51 = vector.broadcast %cst_25 : f32 to vector<8x32xf32>
      %c0_26 = arith.constant 0 : index
      %c0_27 = arith.constant 0 : index
      %52 = vector.load %arg5[%c0_26, %c0_27] : memref<8x32xf32, #tpu.memory_space<vmem>>, vector<8x32xf32>
      tpu.vector_store %arg5[%c0_26, %c0_27], %51 {strides = array<i32>} : memref<8x32xf32, #tpu.memory_space<vmem>>, vector<8x32xf32>,
    } else {
    }
    %c0 = arith.constant 0 : index
    %c0_1 = arith.constant 0 : index
    %3 = vector.load %arg2[%c0, %c0_1] : memref<8x32xbf16, #tpu.memory_space<vmem>>, vector<8x32xbf16>
    %c0_2 = arith.constant 0 : index
    %c0_3 = arith.constant 0 : index
    %4 = vector.load %arg3[%c0_2, %c0_3] : memref<32x64xbf16, #tpu.memory_space<vmem>>, vector<32x64xbf16>
    %cst = arith.constant dense<0.000000e+00> : vector<8x64xf32>
    %5 = tpu.matmul %3, %4, %cst {dimension_numbers = #tpu.dot_dimension_numbers<[1], [0], [0], [1], [0, 0, 1, 1], [], []>} : vector<8x32xbf16>, vector<32x64xbf16>, vector<8x64xf32> -> vector<8x64xf32>
    %cst_4 = arith.constant 5.000000e-01 : f32
    %6 = vector.broadcast %cst_4 : f32 to vector<8x64xf32>
    %7 = arith.mulf %6, %5 : vector<8x64xf32>
    %cst_5 = arith.constant 0.707106769 : f32
    %8 = vector.broadcast %cst_5 : f32 to vector<8x64xf32>
    %9 = arith.mulf %5, %8 : vector<8x64xf32>
    %10 = math.absf %9 : vector<8x64xf32>
    %cst_6 = arith.constant 0.327591091 : f32
    %11 = vector.broadcast %cst_6 : f32 to vector<8x64xf32>
    %12 = arith.mulf %11, %10 : vector<8x64xf32>
    %cst_7 = arith.constant 1.000000e+00 : f32
    %13 = vector.broadcast %cst_7 : f32 to vector<8x64xf32>
    %14 = arith.addf %13, %12 : vector<8x64xf32>
    %15 = tpu.reciprocal %14 {approx = true} : vector<8x64xf32> -> vector<8x64xf32>
    %cst_8 = arith.constant 1.06140542 : f32
    %16 = vector.broadcast %cst_8 : f32 to vector<8x64xf32>
    %17 = arith.mulf %16, %15 : vector<8x64xf32>
    %cst_9 = arith.constant -1.45315206 : f32
    %18 = vector.broadcast %cst_9 : f32 to vector<8x64xf32>
    %19 = arith.addf %17, %18 : vector<8x64xf32>
    %20 = arith.mulf %19, %15 : vector<8x64xf32>
    %cst_10 = arith.constant 1.42141378 : f32
    %21 = vector.broadcast %cst_10 : f32 to vector<8x64xf32>
    %22 = arith.addf %20, %21 : vector<8x64xf32>
    %23 = arith.mulf %22, %15 : vector<8x64xf32>
    %cst_11 = arith.constant -0.284496725 : f32
    %24 = vector.broadcast %cst_11 : f32 to vector<8x64xf32>
    %25 = arith.addf %23, %24 : vector<8x64xf32>
    %26 = arith.mulf %25, %15 : vector<8x64xf32>
    %cst_12 = arith.constant 0.254829586 : f32
    %27 = vector.broadcast %cst_12 : f32 to vector<8x64xf32>
    %28 = arith.addf %26, %27 : vector<8x64xf32>
    %29 = arith.mulf %28, %15 : vector<8x64xf32>
    %cst_13 = arith.constant 0.000000e+00 : f32
    %30 = vector.broadcast %cst_13 : f32 to vector<8x64xf32>
    %31 = arith.subf %30, %10 : vector<8x64xf32>
    %32 = arith.mulf %31, %10 : vector<8x64xf32>
    %33 = math.exp %32 : vector<8x64xf32>
    %34 = arith.mulf %29, %33 : vector<8x64xf32>
    %cst_14 = arith.constant 1.000000e+00 : f32
    %35 = vector.broadcast %cst_14 : f32 to vector<8x64xf32>
    %36 = arith.subf %35, %34 : vector<8x64xf32>
    %cst_15 = arith.constant 0.000000e+00 : f32
    %37 = vector.broadcast %cst_15 : f32 to vector<8x64xf32>
    %38 = arith.cmpf oge, %9, %37 : vector<8x64xf32>
    %cst_16 = arith.constant 0.000000e+00 : f32
    %39 = vector.broadcast %cst_16 : f32 to vector<8x64xf32>
    %40 = arith.subf %39, %36 : vector<8x64xf32>
    %41 = arith.select %38, %36, %40 : vector<8x64xi1>, vector<8x64xf32>
    %cst_17 = arith.constant 1.000000e+00 : f32
    %42 = vector.broadcast %cst_17 : f32 to vector<8x64xf32>
    %43 = arith.addf %42, %41 : vector<8x64xf32>
    %44 = arith.mulf %7, %43 : vector<8x64xf32>
    %c0_18 = arith.constant 0 : index
    %c0_19 = arith.constant 0 : index
    %45 = vector.load %arg5[%c0_18, %c0_19] : memref<8x32xf32, #tpu.memory_space<vmem>>, vector<8x32xf32>
    %46 = arith.truncf %44 : vector<8x64xf32> to vector<8x64xbf16>
    %c0_20 = arith.constant 0 : index
    %c0_21 = arith.constant 0 : index
    %47 = vector.load %arg4[%c0_20, %c0_21] : memref<64x32xbf16, #tpu.memory_space<vmem>>, vector<64x32xbf16>
    %cst_22 = arith.constant dense<0.000000e+00> : vector<8x32xf32>
    %48 = tpu.matmul %46, %47, %cst_22 {dimension_numbers = #tpu.dot_dimension_numbers<[1], [0], [0], [1], [0, 0, 1, 1], [], []>} : vector<8x64xbf16>, vector<64x32xbf16>, vector<8x32xf32> -> vector<8x32xf32>
    %49 = arith.addf %45, %48 : vector<8x32xf32>
    %c0_23 = arith.constant 0 : index
    %c0_24 = arith.constant 0 : index
    %50 = vector.load %arg5[%c0_23, %c0_24] : memref<8x32xf32, #tpu.memory_space<vmem>>, vector<8x32xf32>
    tpu.vector_store %arg5[%c0_23, %c0_24], %49 {strides = array<i32>} : memref<8x32xf32, #tpu.memory_space<vmem>>, vector<8x32xf32>,
    return
  }
  func.func @transform_0(%arg0: i32, %arg1: i32) -> (i32, i32) {
    %c0_i32 = arith.constant 0 : i32
    %c0_i32_0 = arith.constant 0 : i32
    return %arg0, %c0_i32 : i32, i32
  }
  func.func @transform_1(%arg0: i32, %arg1: i32) -> (i32, i32) {
    %c0_i32 = arith.constant 0 : i32
    %c0_i32_0 = arith.constant 0 : i32
    return %c0_i32, %arg1 : i32, i32
  }
  func.func @transform_2(%arg0: i32, %arg1: i32) -> (i32, i32) {
    %c0_i32 = arith.constant 0 : i32
    %c0_i32_0 = arith.constant 0 : i32
    return %arg1, %c0_i32 : i32, i32
  }
  func.func @transform_3(%arg0: i32, %arg1: i32) -> (i32, i32) {
    %c0_i32 = arith.constant 0 : i32
    %c0_i32_0 = arith.constant 0 : i32
    return %arg0, %c0_i32 : i32, i32
  }
}

</mosaic_0001>

<bundles_post_ra>
// kernel: tpu_custom_call.1
= control target key start
LH: loop header
LB: loop body
LE: loop exit
PB: predicated region body
PF: predicated region fallthrough
CT: control target
= control target key end

     0   :  { %8 = vsyncpa [#allocation3], 0  ;;  %s861_s0 = inlined_call_operand.vmem [shape: bf16[16,32], index: 0, kind: input, shape index: {}]   ;;  %s862_s1 = inlined_call_operand.vmem [shape: bf16[32,64], index: 1, kind: input, shape index: {}]   ;;  %s863_s2 = inlined_call_operand.vmem [shape: bf16[64,32], index: 2, kind: input, shape index: {}]   ;;  %s864_s3 = inlined_call_operand.hbm [shape: f32[16,32], index: 3, kind: output, shape index: {}]  }
   0x1   :  { %10 = vsyncpa [#allocation3 + $0x1], 0  ;;  %s719_s12 = smov 0   ;;  %s721_s13 = smov 0  }
   0x2   :  { %s723_s14 = smov 0   ;;  %s725_s15 = smov 0  }
   0x3   :  { %s727_s16 = smov 0   ;;  %s729_s17 = smov 0  }
   0x4 LB: > { %s502_s18 = sadd.s32 4294967295, %s694_s17   ;;  %s503_s19 = sadd.s32 4294967294, %s694_s17   ;;  %s694_s17 = sphi %s729_s17, %s16_s17   ;;  %s690_s16 = sphi %s727_s16, %s871_s16   ;;  %s686_s15 = sphi %s725_s15, %s870_s15   ;;  %s682_s14 = sphi %s723_s14, %s869_s14   ;;  %s678_s13 = sphi %s721_s13, %s868_s13   ;;  %s674_s12 = sphi %s719_s12, %s867_s12  }
   0x5   : > { %s28_s20 = sadd.s32 1, %s690_s16  ;;  %s113_s21 = sadd.s32 1, %s682_s14 }
   0x6   : > { %p30_p0 = scmp.ge.s32.totalorder %s28_s20, 2  ;;  %p123_p1 = scmp.ne.s32.totalorder %s682_s14, %s678_s13 }
   0x7   : > { %p124_p2 = scmp.eq.s32.totalorder %s502_s18, 1  ;;  %p129_p3 = scmp.ne.s32.totalorder %s678_s13, %s674_s12 }
   0x8   : > { %s873_s20 = smov (%p30_p0, %s28_s20), 0  ;;  %p130_p5 = scmp.eq.s32.totalorder %s503_s19, 1 }
   0x9   : > { %p759_p4 = por %p124_p2, %p123_p1  ;;  %s110_s23 = ssub.s32 %s690_s16, %s873_s20 }
   0xa   : > { %p508_p6 = scmp.ge.s32.totalorder %s694_s17, 1  ;;  %p111_p7 = scmp.eq.s32.totalorder %s110_s23, 0 }
   0xb   : > { %p766_p8 = por %p130_p5, %p129_p3  ;;  %p171_p9 = scmp.lt.s32.totalorder %s694_s17, 3 }
   0xc   : > { %s772_s25 = scalar_select %p111_p7, %s682_s14, %s113_s21  }
   0xd   : > { %p172_p10 = pnand %p508_p6, %p171_p9 }
   0xe   : > { %p203_p11 = scmp.lt.s32.totalorder (!%p172_p10), %s686_s15, 1  ;;  %s200_s26 = sand.u32 (!%p172_p10), 1, %s678_s13  }
   0xf   : > { %175 = sbr.rel (%p172_p10) target bundleno = 484 (0x1e4), region = 32  ;;  %s509_s27 = sshll.u32 (!%p172_p10), %s200_s26, 3 }
  0x10   : > { %s801_s28 = scalar_lea.vmem (!%p172_p10), [#allocation2], %s509_s27  ;;  %s520_s29 = sshll.u32 (!%p172_p10), %s686_s15, 7 }
  0x11   : > { %s811_s6 = scalar_lea.hbm (!%p172_p10), %s864_s3, %s520_s29  ;;  %s698_s8 = smov (!%p172_p10), [#allocation2]  }
  0x12   : > { %s622_s9 = sshll.u32 (!%p172_p10), %s698_s8, 4  ;;  %s623_s9 = int_to_ptr.vmem [resolvable:$false] %s622_s9 }
  0x13   : > { %s624_s10 = scalar_lea.vmem (!%p172_p10), %s623_s9, 256 }
  0x14   : > { %v608_v0 = vld [vmem:[%s862_s1 + $0x8] sm:$0xff]   ;;  %v696_v1 = vmov 0.0   ;;  %v609_v2 = vld [vmem:[%s862_s1] sm:$0xff]   ;;  %vm697_vm0 = vmmov 0   ;;  %s204_s30 = scalar_select %p203_p11, %s686_s15, 1  ;;  %vm222_vm1 = vcmask 261120  }
  0x15   : > { %531 = vmatprep.subr.bf16.mxu0 %v696_v1  ;;  %539 = vmatprep.subr.bf16.mxu1 %v696_v1  ;;  %v610_v4 = vld [vmem:[%s863_s2 + $0x18] sm:$0xff]   ;;  %v611_v5 = vld [vmem:[%s863_s2 + $0x10] sm:$0xff]   ;;  %v612_v6 = vld [vmem:[%s863_s2 + $0x8] sm:$0xff]   ;;  %223 = vst.msk [vmem:[%s801_s28] sm:$0xff] %vm222_vm1, %v696_v1  ;;  %vm345_vm3 = vcmask 523264  }
  0x16   : > { %532 = vmatpush3.bf16.msra.mxu0 %v608_v0  ;;  %535 = vmatprep.mubr.msk.bf16.mxu0 %vm697_vm0, %v696_v1  ;;  %s510_s4 = sshll.u32 %s204_s30, 2  ;;  %v613_v7 = vld [vmem:[%s863_s2] sm:$0xff]   ;;  %s405_s30 = sshll.u32 %s801_s28, 4  ;;  %s813_s30 = int_to_ptr.vmem [resolvable:$true] %s405_s30 }
  0x17   : > { %533 = vmatprep.subr.bf16.mxu0 %v696_v1  ;;  %547 = vmatprep.mubr.msk.bf16.mxu1 %vm697_vm0, %v696_v1  ;;  %s206_s7 = scalar_lea.vmem %s861_s0, %s510_s4  ;;  %s618_s15 = scalar_lea.vmem %s813_s30, 128 }
  0x18   : > { %v224_v3 = vld [vmem:[%s206_s7] sm:$0xf]  ;;  %540 = vmatpush3.bf16.msra.mxu1 %v610_v4  ;;  %s392_s7 = scalar_lea.sflag [#allocation3], %s200_s26  ;;  %p619_p12 = scmp.ne.s32.totalorder %s813_s30, %s618_s15 }
  0x19   : > { %541 = vmatprep.subr.bf16.mxu1 %v696_v1  ;;  %p625_p1 = scmp.lt.s32.totalorder %s813_s30, %s623_s9  ;;  %p626_p2 = scmp.lt.s32.totalorder %s624_s10, %s618_s15 }
  0x1a   : > { %534 = vmatpush3.bf16.msra.mxu0 %v609_v2  ;;  %p620_p13 = pnand %p619_p12, %p759_p4 }
  0x1b   : > { %p627_p3 = por %p626_p2, %p625_p1 }
  0x1c   : > { %542 = vmatpush3.bf16.msra.mxu1 %v611_v5  ;;  %v311_v38 = vld [vmem:[%s801_s28] sm:$0xff]  ;;  %p621_p0 = pneg %p620_p13 }
  0x1d   : > { %536 = vmatmul.mubr.msk.bf16.vlgmr.msra.gmra.mxu0 %vm222_vm1, %v224_v3  ;;  %543 = vmatprep.subr.bf16.mxu1 %v696_v1 }
  0x1e   : > { %p628_p5 = pnand %p627_p3, %p621_p0 }
  0x20   : > { %544 = vmatpush3.bf16.msra.mxu1 %v612_v6 }
  0x21   : > { %545 = vmatprep.subr.bf16.mxu1 %v696_v1 }
  0x24   : > { %546 = vmatpush3.bf16.msra.mxu1 %v613_v7 }
  0xdd   : > { %v279_v8 = vpop.f32.mrf.mxu0 }
  0xde   : > { %v286_v9 = vmul.f32 0.70710677, %v279_v8  ;;  %v285_v34 = vmul.f32 0.5, %v279_v8 }
  0xdf   : > { %v537_v10 = vpop.f32.mrf.mxu0 }
  0xe0   : > { %v287_v11 = vand.u32 2147483647, %v286_v9  ;;  %vm306_vm2 = vcmp.ge.f32.partialorder %v286_v9, 0.0 }
  0xe1   : > { %v282_v12 = vpop.f32.mrf.mxu0 }
  0xe2   : > { %v288_v13 = vmul.f32 0.3275911, %v287_v11  ;;  %v300_v16 = vsub.f32 0.0, %v287_v11 }
  0xe3   : > { %v538_v14 = vpop.f32.mrf.mxu0 }
  0xe4   : > { %v289_v15 = vadd.f32 1.0, %v288_v13  ;;  %v301_v17 = vmul.f32 %v300_v16, %v287_v11 }
  0xe6   : > { %614 = vrcp.f32 %v289_v15  ;;  %v302_v20 = vmul.f32 1.442695, %v301_v17 }
  0xe8   : > { %616 = vpow2.f32 %v302_v20 }
  0xf3   : > { %v615_v18 = vpop.eup %614 }
  0xf4   : > { %v291_v19 = vmul.f32 1.0614054, %v615_v18 }
  0xf5   : > { %v617_v29 = vpop.eup %616 }
  0xf6   : > { %v292_v21 = vadd.f32 -1.4531521, %v291_v19 }
  0xf8   : > { %v293_v22 = vmul.f32 %v615_v18, %v292_v21 }
  0xfa   : > { %v294_v23 = vadd.f32 1.4214138, %v293_v22 }
  0xfc   : > { %v295_v24 = vmul.f32 %v615_v18, %v294_v23 }
  0xfe   : > { %v296_v25 = vadd.f32 -0.28449672, %v295_v24 }
 0x100   : > { %v297_v26 = vmul.f32 %v615_v18, %v296_v25 }
 0x102   : > { %v298_v27 = vadd.f32 0.2548296, %v297_v26 }
 0x104   : > { %v299_v28 = vmul.f32 %v615_v18, %v298_v27 }
 0x106   : > { %v304_v30 = vmul.f32 %v617_v29, %v299_v28 }
 0x108   : > { %v305_v31 = vsub.f32 1.0, %v304_v30 }
 0x10a   : > { %v307_v32 = vsub.f32 0.0, %v305_v31 }
 0x10c   : > { %v308_v33 = vsel %vm306_vm2, %v305_v31, %v307_v32 }
 0x10d   : > { %v309_v35 = vadd.f32 1.0, %v308_v33 }
 0x10f   : > { %v310_v36 = vmul.f32 %v309_v35, %v285_v34 }
 0x111   : > { %v312_v37 = vpack.c.bf16 %v310_v36, %v310_v36 }
 0x113   : > { %548 = vmatmul.mubr.msk.bf16.vlgmr.msra.gmra.mxu1 %vm345_vm3, %v312_v37 }
 0x1d3   : > { %v383_v39 = vpop.f32.mrf.mxu1 }
 0x1d4   : > { %v389_v40 = vadd.f32 %v383_v39, %v311_v38 }
 0x1d5   : > { %v549_v41 = vpop.f32.mrf.mxu1 }
 0x1d6   : > { %390 = vst.msk [vmem:[%s801_s28] sm:$0xff] %vm222_vm1, %v389_v40 }
 0x1d7   : > { %v386_v42 = vpop.f32.mrf.mxu1 }
 0x1d8   : > { %631 = shalt.err (!%p628_p5)
}
 0x1d9   : > { %s632_s11 = scalar_lea.hbm %s811_s6, 128  ;;  %s636_s21 = scalar_lea.hbm %s864_s3, 256 }
 0x1da   : > { %p633_p6 = scmp.ne.s32.totalorder %s811_s6, %s632_s11  ;;  %p637_p10 = scmp.lt.s32.totalorder %s811_s6, %s864_s3 }
 0x1db   : > { %p638_p11 = scmp.lt.s32.totalorder %s636_s21, %s632_s11 }
 0x1dc   : > { %p634_p7 = pnand %p633_p6, %p759_p4 }
 0x1dd   : > { %p639_p12 = por %p638_p11, %p637_p10 }
 0x1de   : > { %p635_p9 = pneg %p634_p7 }
 0x1e0   : > { %p640_p13 = pnand %p639_p12, %p635_p9 }
 0x1e2   : > { %643 = shalt.err (!%p640_p13)
}
 0x1e3   : > { %551 = dma.vmem_to_hbm [thread:$0]  (%p759_p4), %s813_s30, 128, %s811_s6, %s392_s7   ;;  %v550_v43 = vpop.f32.mrf.mxu1 }
 0x1e4 PF: > { %p557_p0 = scmp.ge.s32.totalorder %s694_s17, 2  ;;  %s417_s27 = sand.u32 1, %s674_s12  }
 0x1e5   : > { %s418_s28 = scalar_lea.sflag [#allocation3], %s417_s27 }
 0x1e6   : > { %p554_p1 = pnand %p557_p0, %p766_p8 }
 0x1e8   : > { %p555_p2 = pneg %p554_p1 }
 0x1ea   : > { %669 = dma.done.wait (%p555_p2), %s418_s28, 128  }
 0x1eb   : > { %671 = vsyncadd (%p555_p2), %s418_s28, 4294967168  ;;  %s16_s17 = sadd.s32 1, %s694_s17   ;;  %s867_s12 = smov %s678_s13 }
 0x1ec   : > { %p13_p3 = scmp.ge.s32.totalorder %s16_s17, 4   ;;  %s868_s13 = smov %s682_s14 }
 0x1ed   : > { %s869_s14 = smov %s772_s25  ;;  %s870_s15 = smov %s690_s16 }
 0x1ee   : > { %s871_s16 = smov %s873_s20  ;;  %15 = sbr.rel (!%p13_p3) target bundleno = 4 (0x4), region = 77 }
 0x1f3   :  { %423 = vsyncpa [#allocation3], 1 }
 0x1f4   :  { %425 = vsyncpa [#allocation3 + $0x1], 1 }

</bundles_post_ra>
